<compile_context>
chip_gen: v5e
topology: v5e:2x2
jax: 0.10.0
libtpu: 0.0.40
codegen_flags: <defaults>
</compile_context>

<pallas_src>
import jax
import jax.numpy as jnp
from jax.experimental import pallas as pl
from jax.experimental.pallas import tpu as pltpu

# Laplacian kernel constants from the module's __init__.
_W_EDGE = 1.0 / 8.0   # all 8 neighbors
_W_CENTER = -1.0      # center tap


def _laplacian_sq_kernel(x_ref, o_ref):
    # x_ref: (bp, H, W) input planes; o_ref: (bp, H-2, W-2) valid output.
    x = x_ref[...]
    _, h, w = x_ref.shape
    _, ho, wo = o_ref.shape

    # Lane-direction shifts via XLU rolls (shift n-1 == logical shift -1):
    #   x1[..., j] = x[..., j+1], x2[..., j] = x[..., j+2]
    x1 = pltpu.roll(x, w - 1, 2)
    x2 = pltpu.roll(x, w - 2, 2)
    rowsum = x + x1 + x2                       # cols >= wo hold wrapped garbage

    # Sublane-direction shifts:  r1[..., i, :] = rowsum[..., i+1, :]
    r1 = pltpu.roll(rowsum, h - 1, 1)
    r2 = pltpu.roll(rowsum, h - 2, 1)
    box = rowsum + r1 + r2                     # rows >= ho hold wrapped garbage

    # center[..., i, j] = x[..., i+1, j+1]
    center = pltpu.roll(x1, h - 1, 1)

    # lap = (box - center)/8 + center*(-1)  ==  box/8 - 9/8*center
    lap = box * _W_EDGE + center * (_W_CENTER - _W_EDGE)
    lap_sq = lap * lap

    # Single store of the valid region; only the trailing partial vreg per row
    # is masked.  No extra wrapper-side pass over the output.
    o_ref[...] = lap_sq[:, :ho, :wo].astype(o_ref.dtype)


def _round_up(x, m):
    return -(-x // m) * m


def _plane_block(p, h, w, itemsize):
    """Planes per grid step, sized by layout-padded bytes.

    VMEM tiles are padded to (8, 128) on the last two dims, so a narrow-W
    plane occupies far more VMEM than h*w*itemsize suggests.  Aim for ~6 MiB
    of (in + out) per step (~12 MiB double-buffered), never drop below ~1 MiB
    per step (per-step overhead ~0.35us, ~1 MiB of HBM on v7x), and when there
    is enough work keep >= 4 grid steps (2 per v7x TensorCore) with a
    preferably even step count so the "parallel" axis shards evenly.
    """
    pad_in = _round_up(h, 8) * _round_up(w, 128)
    pad_out = _round_up(h - 2, 8) * _round_up(w - 2, 128)
    per_plane = itemsize * (pad_in + pad_out)

    target_step_bytes = 6 << 20    # ~6 MiB in+out per step
    floor_step_bytes = 1 << 20     # below this, per-step overhead dominates

    bp_by_bytes = max(1, target_step_bytes // per_plane)
    bp_floor = max(1, floor_step_bytes // per_plane)
    bp_for_steps = -(-p // 4)      # leave >= 4 steps when the problem is big

    bp = min(bp_by_bytes, p)
    bp = max(min(bp, bp_for_steps), min(bp_floor, p))
    bp = max(min(bp, p), 1)

    # Prefer an even step count (equal work for v7x's two cores).
    steps = -(-p // bp)
    if steps > 1 and steps % 2:
        bp_even = max(1, -(-p // (steps + 1)))
        if (-(-p // bp_even)) % 2 == 0:
            bp = bp_even

    return bp, per_plane


def gradient_forward(x):
    """x: (N, C, H, W) float32 -> (N, C, H-2, W-2): squared valid Laplacian."""
    n, c, h, w = x.shape
    assert h >= 3 and w >= 3, "valid 3x3 conv needs H, W >= 3"
    ho, wo = h - 2, w - 2
    p = n * c
    x_flat = x.reshape(p, h, w)        # merges leading dims: metadata-only

    itemsize = jnp.dtype(x.dtype).itemsize
    bp, per_plane_bytes = _plane_block(p, h, w, itemsize)
    steps = -(-p // bp)                # cdiv; partial last block is OK

    # Double-buffered in+out plus slack; raise the scoped VMEM limit to match
    # (v5e default is only 16 MiB), but stay <= 32 MiB for v7x's 64 MiB VMEM.
    vmem_limit = int(min(max(4 * bp * per_plane_bytes, 16 << 20), 32 << 20))

    # Advisory hint: mem-bound, no transcendentals.
    cost = pl.CostEstimate(
        flops=11 * p * ho * wo,
        transcendentals=0,
        bytes_accessed=itemsize * p * (h * w + ho * wo),
    )

    # NOTE: for MB-scale blocks, sweeping pipeline_mode=pl.Buffered(3) on the
    # input BlockSpec can hide residual exposed DMA; default depth kept here.
    out = pl.pallas_call(
        _laplacian_sq_kernel,
        out_shape=jax.ShapeDtypeStruct((p, ho, wo), x.dtype),
        grid_spec=pltpu.PrefetchScalarGridSpec(
            num_scalar_prefetch=0,
            grid=(steps,),
            in_specs=[pl.BlockSpec((bp, h, w), lambda i: (i, 0, 0))],
            out_specs=pl.BlockSpec((bp, ho, wo), lambda i: (i, 0, 0)),
        ),
        compiler_params=pltpu.CompilerParams(
            dimension_semantics=("parallel",),
            vmem_limit_bytes=vmem_limit,
        ),
        cost_estimate=cost,
    )(x_flat)

    return out.reshape(n, c, ho, wo)   # splits leading dim: metadata-only


def _reference(x):
    # Depthwise 3x3 valid conv with the Laplacian kernel, then square.
    c = x.shape[1]
    k = jnp.array([[1 / 8, 1 / 8, 1 / 8],
                   [1 / 8, -1.0, 1 / 8],
                   [1 / 8, 1 / 8, 1 / 8]], dtype=jnp.float32)
    kern = jnp.tile(k[None, None], (c, 1, 1, 1))   # (C, 1, 3, 3) OIHW depthwise
    y = jax.lax.conv_general_dilated(
        x, kern, window_strides=(1, 1), padding="VALID",
        dimension_numbers=("NCHW", "OIHW", "NCHW"),
        feature_group_count=c)
    return y ** 2


if __name__ == "__main__":
    key = jax.random.PRNGKey(0)
    N, C, H, W = 2, 4, 16, 16
    x = jax.random.normal(key, (N, C, H, W), dtype=jnp.float32)

    out = gradient_forward(x)
    jax.block_until_ready(out)

    ref = _reference(x)
    assert out.shape == (N, C, H - 2, W - 2), out.shape
    assert jnp.allclose(out, ref, atol=1e-5, rtol=1e-5), float(
        jnp.max(jnp.abs(out - ref)))

    print("KERNEL_OK")
</pallas_src>

<mosaic_0001>
module attributes {stable_mosaic.version = 11 : i64} {
  func.func @_laplacian_sq_kernel(%arg0: i32, %arg1: memref<8x16x16xf32, #tpu.memory_space<vmem>>, %arg2: memref<8x14x14xf32, #tpu.memory_space<vmem>>) attributes {dimension_semantics = [#tpu.dimension_semantics<parallel>], iteration_bounds = array<i64: 1>, scalar_prefetch = 0 : i64, scratch_operands = 0 : i64, tpu.core_type = #tpu.core_type<tc>, window_params = [{transform_indices = @transform_0, window_bounds = array<i64: 8, 16, 16>}, {transform_indices = @transform_1, window_bounds = array<i64: 8, 14, 14>}]} {
    %c0 = arith.constant 0 : index
    %c0_0 = arith.constant 0 : index
    %c0_1 = arith.constant 0 : index
    %0 = vector.load %arg1[%c0, %c0_0, %c0_1] : memref<8x16x16xf32, #tpu.memory_space<vmem>>, vector<8x16x16xf32>
    %c15_i32 = arith.constant 15 : i32
    %1 = tpu.dynamic_rotate %0 by %c15_i32 dim 2 : vector<8x16x16xf32>, i32 -> vector<8x16x16xf32>
    %c14_i32 = arith.constant 14 : i32
    %2 = tpu.dynamic_rotate %0 by %c14_i32 dim 2 : vector<8x16x16xf32>, i32 -> vector<8x16x16xf32>
    %3 = arith.addf %0, %1 : vector<8x16x16xf32>
    %4 = arith.addf %3, %2 : vector<8x16x16xf32>
    %c15_i32_2 = arith.constant 15 : i32
    %5 = tpu.dynamic_rotate %4 by %c15_i32_2 dim 1 : vector<8x16x16xf32>, i32 -> vector<8x16x16xf32>
    %c14_i32_3 = arith.constant 14 : i32
    %6 = tpu.dynamic_rotate %4 by %c14_i32_3 dim 1 : vector<8x16x16xf32>, i32 -> vector<8x16x16xf32>
    %7 = arith.addf %4, %5 : vector<8x16x16xf32>
    %8 = arith.addf %7, %6 : vector<8x16x16xf32>
    %c15_i32_4 = arith.constant 15 : i32
    %9 = tpu.dynamic_rotate %1 by %c15_i32_4 dim 1 : vector<8x16x16xf32>, i32 -> vector<8x16x16xf32>
    %cst = arith.constant 1.250000e-01 : f32
    %10 = vector.broadcast %cst : f32 to vector<8x16x16xf32>
    %11 = arith.mulf %8, %10 : vector<8x16x16xf32>
    %cst_5 = arith.constant -1.125000e+00 : f32
    %12 = vector.broadcast %cst_5 : f32 to vector<8x16x16xf32>
    %13 = arith.mulf %9, %12 : vector<8x16x16xf32>
    %14 = arith.addf %11, %13 : vector<8x16x16xf32>
    %15 = arith.mulf %14, %14 : vector<8x16x16xf32>
    %16 = vector.extract_strided_slice %15 {offsets = [0, 0, 0], sizes = [8, 14, 14], strides = [1, 1, 1]} : vector<8x16x16xf32> to vector<8x14x14xf32>
    %c0_6 = arith.constant 0 : index
    %c0_7 = arith.constant 0 : index
    %c0_8 = arith.constant 0 : index
    %17 = vector.load %arg2[%c0_6, %c0_7, %c0_8] : memref<8x14x14xf32, #tpu.memory_space<vmem>>, vector<8x14x14xf32>
    tpu.vector_store %arg2[%c0_6, %c0_7, %c0_8], %16 {strides = array<i32>} : memref<8x14x14xf32, #tpu.memory_space<vmem>>, vector<8x14x14xf32>,
    return
  }
  func.func @transform_0(%arg0: i32) -> (i32, i32, i32) {
    %c0_i32 = arith.constant 0 : i32
    %c0_i32_0 = arith.constant 0 : i32
    %c0_i32_1 = arith.constant 0 : i32
    return %arg0, %c0_i32, %c0_i32_0 : i32, i32, i32
  }
  func.func @transform_1(%arg0: i32) -> (i32, i32, i32) {
    %c0_i32 = arith.constant 0 : i32
    %c0_i32_0 = arith.constant 0 : i32
    %c0_i32_1 = arith.constant 0 : i32
    return %arg0, %c0_i32, %c0_i32_0 : i32, i32, i32
  }
}

</mosaic_0001>

<bundles_post_ra>
// kernel: tpu_custom_call.1
= control target key start
LH: loop header
LB: loop body
LE: loop exit
PB: predicated region body
PF: predicated region fallthrough
CT: control target
= control target key end

     0   :  { %6 = vsyncpa [#allocation3], 0  ;;  %s532_s9 = smov [#allocation2]   ;;  %s533_s11 = smov 128   ;;  %s998_s0 = inlined_call_operand.hbm [shape: f32[8,16,16], index: 0, kind: input, shape index: {}]   ;;  %s999_s1 = inlined_call_operand.vmem [shape: f32[8,14,14], index: 1, kind: output, shape index: {}]  }
   0x1   :  { %s11_s8 = sshll.u32 %s998_s0, 4  ;;  %s13_s10 = sshll.u32 %s532_s9, 4  ;;  %s12_s8 = int_to_ptr.hbm [resolvable:$true] %s11_s8  ;;  %s14_s10 = int_to_ptr.vmem [resolvable:$true] %s13_s10 }
   0x2   :  { %s534_s12 = smov 8  }
   0x3   :  { %19 = dma.hbm_to_vmem [thread:$0]  %s12_s8, 2048, %s14_s10, [#allocation3], %s533_s11, %s533_s11, %s534_s12  }
   0x4   :  { %530 = dma.done.wait [#allocation3], 2048  }
   0x5   :  { %531 = vsyncadd [#allocation3], 4294965248  ;;  %v551_v0 = vld [vmem:[#allocation2 + $0x10] sm:$0xff]  ;;  %v553_v1 = vld [vmem:[#allocation2] sm:$0xff]  ;;  %s535_s13 = smov 16   ;;  %vm40_vm0 = vcmask 1047680  }
   0x6   :  { %47 = vrot.lane.b32.xlu1 %v551_v0, %s535_s13  ;;  %41 = vrot.lane.b32.xlu0 %v553_v1, %s535_s13  ;;  %v559_v2 = vld [vmem:[#allocation2 + $0x20] sm:$0xff]  ;;  %v563_v3 = vld [vmem:[#allocation2 + $0x18] sm:$0xff]  ;;  %v565_v4 = vld [vmem:[#allocation2 + $0x8] sm:$0xff]  ;;  %s536_s0 = smov 127   ;;  %s537_s14 = smov 126   ;;  %vm477_vm3 = vcmask 113664  }
   0x7   :  { %53 = vrot.lane.b32.xlu2 %v559_v2, %s535_s13  ;;  %v567_v5 = vld [vmem:[#allocation2 + $0x28] sm:$0xff]  ;;  %v575_v6 = vld [vmem:[#allocation2 + $0x30] sm:$0xff]  ;;  %v577_v7 = vld [vmem:[#allocation2 + $0x38] sm:$0xff]  ;;  %vm479_vm4 = vcmask 111616  }
   0x8   :  { %v579_v8 = vld [vmem:[#allocation2 + $0x40] sm:$0xff]  ;;  %v587_v9 = vld [vmem:[#allocation2 + $0x48] sm:$0xff]  ;;  %v589_v10 = vld [vmem:[#allocation2 + $0x50] sm:$0xff] }
   0x9   :  { %v591_v11 = vld [vmem:[#allocation2 + $0x58] sm:$0xff]  ;;  %v599_v12 = vld [vmem:[#allocation2 + $0x60] sm:$0xff]  ;;  %v601_v13 = vld [vmem:[#allocation2 + $0x68] sm:$0xff] }
   0xa   :  { %v603_v14 = vld [vmem:[#allocation2 + $0x70] sm:$0xff]  ;;  %v611_v15 = vld [vmem:[#allocation2 + $0x78] sm:$0xff] }
   0xe   :  { %50 = vrot.lane.b32.xlu1 %v563_v3, %s535_s13  ;;  %44 = vrot.lane.b32.xlu0 %v565_v4, %s535_s13 }
   0xf   :  { %56 = vrot.lane.b32.xlu2 %v567_v5, %s535_s13 }
  0x16   :  { %59 = vrot.lane.b32.xlu0 %v575_v6, %s535_s13  ;;  %62 = vrot.lane.b32.xlu1 %v577_v7, %s535_s13 }
  0x17   :  { %65 = vrot.lane.b32.xlu2 %v579_v8, %s535_s13 }
  0x1e   :  { %68 = vrot.lane.b32.xlu0 %v587_v9, %s535_s13  ;;  %71 = vrot.lane.b32.xlu1 %v589_v10, %s535_s13 }
  0x1f   :  { %74 = vrot.lane.b32.xlu2 %v591_v11, %s535_s13 }
  0x26   :  { %77 = vrot.lane.b32.xlu0 %v599_v12, %s535_s13  ;;  %80 = vrot.lane.b32.xlu1 %v601_v13, %s535_s13 }
  0x27   :  { %83 = vrot.lane.b32.xlu2 %v603_v14, %s535_s13 }
  0x2e   :  { %86 = vrot.lane.b32.xlu0 %v611_v15, %s535_s13 }
  0x61   :  { %v54_v16 = vpop.permute.xlu2 %53 }
  0x62   :  { %v55_v32 = vsel %vm40_vm0, %v54_v16, %v559_v2 }
  0x69   :  { %v57_v17 = vpop.permute.xlu2 %56 }
  0x6a   :  { %v58_v22 = vsel %vm40_vm0, %v57_v17, %v567_v5 }
  0x71   :  { %v66_v23 = vpop.permute.xlu2 %65 }
  0x72   :  { %v67_v28 = vsel %vm40_vm0, %v66_v23, %v579_v8 }
  0x78   :  { %v48_v18 = vpop.permute.xlu1 %47  ;;  %v42_v19 = vpop.permute.xlu0 %41 }
  0x79   :  { %v49_v20 = vsel %vm40_vm0, %v48_v18, %v551_v0  ;;  %v43_v21 = vsel %vm40_vm0, %v42_v19, %v553_v1  ;;  %v75_v33 = vpop.permute.xlu2 %74 }
  0x7a   :  { %93 = vrot.lane.b32.xlu0 %v49_v20, %s535_s13  ;;  %89 = vrot.lane.b32.xlu1 %v43_v21, %s535_s13  ;;  %v76_v34 = vsel %vm40_vm0, %v75_v33, %v591_v11 }
  0x80   :  { %v51_v24 = vpop.permute.xlu1 %50  ;;  %v45_v25 = vpop.permute.xlu0 %44 }
  0x81   :  { %v52_v26 = vsel %vm40_vm0, %v51_v24, %v563_v3  ;;  %v46_v27 = vsel %vm40_vm0, %v45_v25, %v565_v4  ;;  %v84_v39 = vpop.permute.xlu2 %83 }
  0x82   :  { %99 = vrot.lane.b32.xlu0 %v58_v22, %s535_s13  ;;  %95 = vrot.lane.b32.xlu1 %v52_v26, %s535_s13  ;;  %v85_v40 = vsel %vm40_vm0, %v84_v39, %v603_v14 }
  0x83   :  { %91 = vrot.lane.b32.xlu2 %v46_v27, %s535_s13 }
  0x88   :  { %v60_v29 = vpop.permute.xlu0 %59  ;;  %v63_v31 = vpop.permute.xlu1 %62 }
  0x89   :  { %v61_v30 = vsel %vm40_vm0, %v60_v29, %v575_v6  ;;  %v64_v36 = vsel %vm40_vm0, %v63_v31, %v577_v7 }
  0x8a   :  { %105 = vrot.lane.b32.xlu0 %v67_v28, %s535_s13  ;;  %101 = vrot.lane.b32.xlu1 %v61_v30, %s535_s13 }
  0x8b   :  { %97 = vrot.lane.b32.xlu2 %v55_v32, %s535_s13 }
  0x90   :  { %v69_v35 = vpop.permute.xlu0 %68  ;;  %v72_v38 = vpop.permute.xlu1 %71 }
  0x91   :  { %v70_v37 = vsel %vm40_vm0, %v69_v35, %v587_v9  ;;  %v73_v42 = vsel %vm40_vm0, %v72_v38, %v589_v10 }
  0x92   :  { %111 = vrot.lane.b32.xlu0 %v76_v34, %s535_s13  ;;  %107 = vrot.lane.b32.xlu1 %v70_v37, %s535_s13 }
  0x93   :  { %103 = vrot.lane.b32.xlu2 %v64_v36, %s535_s13 }
  0x98   :  { %v78_v41 = vpop.permute.xlu0 %77  ;;  %v81_v44 = vpop.permute.xlu1 %80 }
  0x99   :  { %v79_v43 = vsel %vm40_vm0, %v78_v41, %v599_v12  ;;  %v82_v46 = vsel %vm40_vm0, %v81_v44, %v601_v13 }
  0x9a   :  { %117 = vrot.lane.b32.xlu0 %v85_v40, %s535_s13  ;;  %113 = vrot.lane.b32.xlu1 %v79_v43, %s535_s13  ;;  %v297_v43 = vlaneseq }
  0x9b   :  { %109 = vrot.lane.b32.xlu2 %v73_v42, %s535_s13 }
  0xa0   :  { %v87_v45 = vpop.permute.xlu0 %86 }
  0xa1   :  { %v88_v47 = vsel %vm40_vm0, %v87_v45, %v611_v15 }
  0xa2   :  { %119 = vrot.lane.b32.xlu1 %v88_v47, %s535_s13  ;;  %v723_v47 = vshrl.u32 %v297_v43, 7 }
  0xa3   :  { %115 = vrot.lane.b32.xlu2 %v82_v46, %s535_s13 }
  0xa4   :  { %vm299_vm1 = vcmp.lt.s32.totalorder %v723_v47, 7  ;;  %vm332_vm2 = vcmp.lt.s32.totalorder %v723_v47, 6 }
  0xdd   :  { %v92_v48 = vpop.permute.xlu2 %91 }
  0xde   :  { %v122_v49 = vsel %vm40_vm0, %v92_v48, %v565_v4 }
  0xdf   :  { %155 = vrot.lane.b32.xlu0 %v122_v49, %s536_s0 }
  0xe5   :  { %v98_v50 = vpop.permute.xlu2 %97 }
  0xe6   :  { %v125_v51 = vsel %vm40_vm0, %v98_v50, %v559_v2 }
  0xe7   :  { %161 = vrot.lane.b32.xlu0 %v125_v51, %s536_s0 }
  0xec   :  { %v90_v52 = vpop.permute.xlu1 %89  ;;  %v94_v53 = vpop.permute.xlu0 %93 }
  0xed   :  { %v104_v54 = vpop.permute.xlu2 %103  ;;  %v121_v55 = vsel %vm40_vm0, %v90_v52, %v553_v1  ;;  %v123_v56 = vsel %vm40_vm0, %v94_v53, %v551_v0 }
  0xee   :  { %153 = vrot.lane.b32.xlu2 %v121_v55, %s536_s0  ;;  %v128_v57 = vsel %vm40_vm0, %v104_v54, %v577_v7  ;;  %157 = vrot.lane.b32.xlu1 %v123_v56, %s536_s0 }
  0xef   :  { %167 = vrot.lane.b32.xlu0 %v128_v57, %s536_s0 }
  0xf4   :  { %v96_v58 = vpop.permute.xlu1 %95  ;;  %v100_v59 = vpop.permute.xlu0 %99 }
  0xf5   :  { %v110_v60 = vpop.permute.xlu2 %109  ;;  %v124_v61 = vsel %vm40_vm0, %v96_v58, %v563_v3  ;;  %v126_v62 = vsel %vm40_vm0, %v100_v59, %v567_v5 }
  0xf6   :  { %159 = vrot.lane.b32.xlu2 %v124_v61, %s536_s0  ;;  %v131_v63 = vsel %vm40_vm0, %v110_v60, %v589_v10  ;;  %163 = vrot.lane.b32.xlu1 %v126_v62, %s536_s0 }
  0xf7   :  { %173 = vrot.lane.b32.xlu0 %v131_v63, %s536_s0 }
  0xfc   :  { %v102_v16 = vpop.permute.xlu1 %101  ;;  %v106_v17 = vpop.permute.xlu0 %105 }
  0xfd   :  { %v116_v18 = vpop.permute.xlu2 %115  ;;  %v127_v19 = vsel %vm40_vm0, %v102_v16, %v575_v6  ;;  %v129_v20 = vsel %vm40_vm0, %v106_v17, %v579_v8 }
  0xfe   :  { %v134_v21 = vsel %vm40_vm0, %v116_v18, %v601_v13  ;;  %165 = vrot.lane.b32.xlu2 %v127_v19, %s536_s0  ;;  %169 = vrot.lane.b32.xlu1 %v129_v20, %s536_s0 }
  0xff   :  { %179 = vrot.lane.b32.xlu0 %v134_v21, %s536_s0 }
 0x104   :  { %v108_v22 = vpop.permute.xlu1 %107  ;;  %v112_v23 = vpop.permute.xlu0 %111 }
 0x105   :  { %v130_v24 = vsel %vm40_vm0, %v108_v22, %v587_v9  ;;  %v132_v25 = vsel %vm40_vm0, %v112_v23, %v591_v11 }
 0x106   :  { %171 = vrot.lane.b32.xlu2 %v130_v24, %s536_s0  ;;  %175 = vrot.lane.b32.xlu1 %v132_v25, %s536_s0 }
 0x107   :  { %217 = vrot.lane.b32.xlu0 %v121_v55, %s537_s14 }
 0x10c   :  { %v114_v26 = vpop.permute.xlu1 %113  ;;  %v118_v27 = vpop.permute.xlu0 %117 }
 0x10d   :  { %v133_v28 = vsel %vm40_vm0, %v114_v26, %v599_v12  ;;  %v135_v29 = vsel %vm40_vm0, %v118_v27, %v603_v14 }
 0x10e   :  { %177 = vrot.lane.b32.xlu2 %v133_v28, %s536_s0  ;;  %181 = vrot.lane.b32.xlu1 %v135_v29, %s536_s0 }
 0x10f   :  { %223 = vrot.lane.b32.xlu0 %v124_v61, %s537_s14 }
 0x114   :  { %v120_v30 = vpop.permute.xlu1 %119 }
 0x115   :  { %v136_v31 = vsel %vm40_vm0, %v120_v30, %v611_v15 }
 0x116   :  { %183 = vrot.lane.b32.xlu2 %v136_v31, %s536_s0  ;;  %219 = vrot.lane.b32.xlu1 %v122_v49, %s537_s14 }
 0x117   :  { %229 = vrot.lane.b32.xlu0 %v127_v19, %s537_s14 }
 0x11e   :  { %221 = vrot.lane.b32.xlu2 %v123_v56, %s537_s14  ;;  %225 = vrot.lane.b32.xlu1 %v125_v51, %s537_s14 }
 0x11f   :  { %235 = vrot.lane.b32.xlu0 %v130_v24, %s537_s14 }
 0x126   :  { %227 = vrot.lane.b32.xlu2 %v126_v62, %s537_s14  ;;  %231 = vrot.lane.b32.xlu1 %v128_v57, %s537_s14 }
 0x127   :  { %241 = vrot.lane.b32.xlu0 %v133_v28, %s537_s14 }
 0x12e   :  { %233 = vrot.lane.b32.xlu2 %v129_v20, %s537_s14  ;;  %237 = vrot.lane.b32.xlu1 %v131_v63, %s537_s14 }
 0x12f   :  { %247 = vrot.lane.b32.xlu0 %v136_v31, %s537_s14 }
 0x136   :  { %239 = vrot.lane.b32.xlu2 %v132_v25, %s537_s14  ;;  %243 = vrot.lane.b32.xlu1 %v134_v21, %s537_s14 }
 0x13e   :  { %245 = vrot.lane.b32.xlu2 %v135_v29, %s537_s14 }
 0x148   :  { %v154_v32 = vpop.permute.xlu2 %153 }
 0x149   :  { %v381_v48 = vrot.slane %v154_v32, 1  ;;  %v201_v59 = vadd.f32 %v154_v32, %v553_v1 }
 0x150   :  { %v160_v33 = vpop.permute.xlu2 %159 }
 0x151   :  { %v156_v34 = vpop.permute.xlu0 %155  ;;  %v390_v53 = vrot.slane %v160_v33, 1  ;;  %v204_v60 = vadd.f32 %v160_v33, %v563_v3 }
 0x152   :  { %v389_v49 = vrot.slane %v156_v34, 1  ;;  %v202_v61 = vadd.f32 %v156_v34, %v565_v4 }
 0x154   :  { %v397_v54 = vsel %vm299_vm1, %v381_v48, %v389_v49  ;;  %v405_v55 = vsel %vm299_vm1, %v389_v49, %v381_v48 }
 0x155   :  { %v735_v62 = vmul.f32 -1.125, %v397_v54  ;;  %v737_v63 = vmul.f32 -1.125, %v405_v55 }
 0x158   :  { %v166_v35 = vpop.permute.xlu2 %165 }
 0x159   :  { %v162_v36 = vpop.permute.xlu0 %161  ;;  %v384_v56 = vrot.slane %v166_v35, 1  ;;  %v747_v3 = vadd.f32 %v166_v35, %v575_v6 }
 0x15a   :  { %v750_v4 = vadd.f32 %v162_v36, %v559_v2  ;;  %v383_v23 = vrot.slane %v162_v36, 1 }
 0x160   :  { %v711_v37 = vpop.permute.xlu2 %171  ;;  %v158_v38 = vpop.permute.xlu1 %157 }
 0x161   :  { %v168_v39 = vpop.permute.xlu0 %167  ;;  %v382_v57 = vrot.slane %v158_v38, 1  ;;  %v203_v16 = vadd.f32 %v158_v38, %v551_v0  ;;  %v758_v24 = vadd.f32 %v711_v37, %v587_v9  ;;  %v393_v25 = vrot.slane %v711_v37, 1 }
 0x162   :  { %v392_v58 = vrot.slane %v168_v39, 1  ;;  %v762_v6 = vadd.f32 %v168_v39, %v577_v7 }
 0x163   :  { %v398_v17 = vsel %vm299_vm1, %v382_v57, %v390_v53  ;;  %v406_v18 = vsel %vm299_vm1, %v390_v53, %v382_v57 }
 0x164   :  { %v400_v19 = vsel %vm299_vm1, %v384_v56, %v392_v58  ;;  %v408_v20 = vsel %vm299_vm1, %v392_v58, %v384_v56  ;;  %v431_v2 = vmul.f32 -1.125, %v398_v17  ;;  %v432_v27 = vmul.f32 -1.125, %v406_v18 }
 0x165   :  { %v764_v28 = vmul.f32 -1.125, %v400_v19  ;;  %v766_v30 = vmul.f32 -1.125, %v408_v20 }
 0x168   :  { %v713_v40 = vpop.permute.xlu2 %177  ;;  %v164_v41 = vpop.permute.xlu1 %163 }
 0x169   :  { %v715_v42 = vpop.permute.xlu0 %173  ;;  %v391_v1 = vrot.slane %v164_v41, 1  ;;  %v776_v35 = vadd.f32 %v713_v40, %v599_v12  ;;  %v387_v36 = vrot.slane %v713_v40, 1  ;;  %v206_v37 = vadd.f32 %v164_v41, %v567_v5 }
 0x16a   :  { %v782_v38 = vadd.f32 %v715_v42, %v589_v10  ;;  %v386_v39 = vrot.slane %v715_v42, 1 }
 0x16b   :  { %v399_v31 = vsel %vm299_vm1, %v383_v23, %v391_v1  ;;  %v407_v9 = vsel %vm299_vm1, %v391_v1, %v383_v23 }
 0x16c   :  { %v789_v12 = vmul.f32 -1.125, %v399_v31 }
 0x170   :  { %v717_v44 = vpop.permute.xlu2 %183  ;;  %v719_v45 = vpop.permute.xlu1 %169 }
 0x171   :  { %v721_v46 = vpop.permute.xlu0 %179  ;;  %v385_v32 = vrot.slane %v719_v45, 1  ;;  %v802_v18 = vadd.f32 %v717_v44, %v611_v15 }
 0x172   :  { %v809_v19 = vadd.f32 %v721_v46, %v601_v13  ;;  %v395_v20 = vrot.slane %v721_v46, 1 }
 0x173   :  { %v401_v10 = vsel %vm299_vm1, %v385_v32, %v393_v25  ;;  %v409_v1 = vsel %vm299_vm1, %v393_v25, %v385_v32 }
 0x174   :  { %v814_v23 = vmul.f32 -1.125, %v401_v10 }
 0x178   :  { %v222_v50 = vpop.permute.xlu2 %221  ;;  %v726_v51 = vpop.permute.xlu1 %175 }
 0x179   :  { %v218_v52 = vpop.permute.xlu0 %217  ;;  %v267_v0 = vadd.f32 %v222_v50, %v203_v16  ;;  %v791_v50 = vmul.f32 -1.125, %v407_v9  ;;  %v394_v56 = vrot.slane %v726_v51, 1 }
 0x17a   :  { %v265_v53 = vadd.f32 %v218_v52, %v201_v59  ;;  %v396_v52 = vrot.slane %v717_v44, 1  ;;  %v209_v59 = vadd.f32 %v719_v45, %v579_v8 }
 0x17b   :  { %v282_v7 = vrot.slane %v267_v0, 1  ;;  %v317_v43 = vrot.slane %v267_v0, 2  ;;  %v402_v31 = vsel %vm299_vm1, %v386_v39, %v394_v56  ;;  %v410_v8 = vsel %vm299_vm1, %v394_v56, %v386_v39 }
 0x17c   :  { %v281_v15 = vrot.slane %v265_v53, 1  ;;  %v316_v9 = vrot.slane %v265_v53, 2 }
 0x180   :  { %v228_v21 = vpop.permute.xlu2 %227  ;;  %v754_v22 = vpop.permute.xlu1 %181 }
 0x181   :  { %v224_v26 = vpop.permute.xlu0 %223  ;;  %v388_v56 = vrot.slane %v754_v22, 1 }
 0x182   :  { %v268_v29 = vadd.f32 %v224_v26, %v204_v60 }
 0x184   :  { %v290_v33 = vrot.slane %v268_v29, 1  ;;  %v325_v34 = vrot.slane %v268_v29, 2 }
 0x186   :  { %v301_v48 = vsel %vm299_vm1, %v282_v7, %v290_v33  ;;  %v309_v49 = vsel %vm299_vm1, %v290_v33, %v282_v7  ;;  %v334_v42 = vsel %vm332_vm2, %v317_v43, %v325_v34  ;;  %v342_v54 = vsel %vm332_vm2, %v325_v34, %v317_v43 }
 0x187   :  { %v351_v5 = vadd.f32 %v301_v48, %v267_v0  ;;  %v352_v41 = vadd.f32 %v309_v49, %v268_v29  ;;  %v270_v7 = vadd.f32 %v228_v21, %v206_v37  ;;  %v824_v49 = vmul.f32 -1.125, %v409_v1 }
 0x188   :  { %v220_v55 = vpop.permute.xlu1 %219  ;;  %v234_v60 = vpop.permute.xlu2 %233 }
 0x189   :  { %v367_v57 = vadd.f32 %v351_v5, %v334_v42  ;;  %v368_v58 = vadd.f32 %v352_v41, %v342_v54  ;;  %v266_v16 = vadd.f32 %v220_v55, %v202_v61  ;;  %v230_v17 = vpop.permute.xlu0 %229  ;;  %v828_v5 = vadd.f32 %v726_v51, %v591_v11 }
 0x18a   :  { %v273_v37 = vadd.f32 %v234_v60, %v209_v59  ;;  %v839_v11 = vmul.f32 -1.125, %v402_v31  ;;  %v841_v51 = vmul.f32 -1.125, %v410_v8  ;;  %v215_v42 = vadd.f32 %v754_v22, %v603_v14 }
 0x18b   :  { %v415_v61 = vmul.f32 0.125, %v367_v57  ;;  %v416_v0 = vmul.f32 0.125, %v368_v58  ;;  %v289_v26 = vrot.slane %v266_v16, 1  ;;  %v324_v29 = vrot.slane %v266_v16, 2 }
 0x18c   :  { %v291_v55 = vrot.slane %v270_v7, 1  ;;  %v326_v60 = vrot.slane %v270_v7, 2 }
 0x18d   :  { %v447_v13 = vadd.f32 %v431_v2, %v415_v61  ;;  %v448_v45 = vadd.f32 %v432_v27, %v416_v0  ;;  %v300_v25 = vsel %vm299_vm1, %v281_v15, %v289_v26  ;;  %v308_v32 = vsel %vm299_vm1, %v289_v26, %v281_v15 }
 0x18e   :  { %v349_v43 = vadd.f32 %v300_v25, %v265_v53  ;;  %v350_v48 = vadd.f32 %v308_v32, %v266_v16  ;;  %v333_v2 = vsel %vm332_vm2, %v316_v9, %v324_v29  ;;  %v341_v21 = vsel %vm332_vm2, %v324_v29, %v316_v9 }
 0x18f   :  { %v463_v33 = vmul.f32 %v447_v13, %v447_v13  ;;  %v464_v34 = vmul.f32 %v448_v45, %v448_v45  ;;  %v285_v61 = vrot.slane %v273_v37, 1  ;;  %v271_v15 = vadd.f32 %v230_v17, %v747_v3 }
 0x190   :  { %v226_v27 = vpop.permute.xlu1 %225  ;;  %v365_v39 = vadd.f32 %v349_v43, %v333_v2  ;;  %v366_v41 = vadd.f32 %v350_v48, %v341_v21  ;;  %v240_v58 = vpop.permute.xlu2 %239  ;;  %v320_v26 = vrot.slane %v273_v37, 2  ;;  %v874_v43 = vsel %vm299_vm1, %v388_v56, %v396_v52 }
 0x191   :  { %481 = vst.msk [vmem:[%s999_s1 + $0x10] sm:$0xff] %vm477_vm3, %v463_v33  ;;  %v269_v10 = vadd.f32 %v226_v27, %v750_v4  ;;  %v236_v53 = vpop.permute.xlu0 %235 }
 0x192   :  { %482 = vst.msk [vmem:[%s999_s1 + $0x18] sm:$0x3f] %vm479_vm4, %v464_v34  ;;  %v274_v54 = vadd.f32 %v236_v53, %v758_v24  ;;  %v413_v57 = vmul.f32 0.125, %v365_v39  ;;  %v414_v4 = vmul.f32 0.125, %v366_v41  ;;  %v284_v53 = vrot.slane %v271_v15, 1 }
 0x193   :  { %v283_v16 = vrot.slane %v269_v10, 1  ;;  %v318_v59 = vrot.slane %v269_v10, 2 }
 0x194   :  { %v293_v1 = vrot.slane %v274_v54, 1  ;;  %v445_v14 = vadd.f32 %v735_v62, %v413_v57  ;;  %v446_v0 = vadd.f32 %v737_v63, %v414_v4  ;;  %v328_v29 = vrot.slane %v274_v54, 2 }
 0x195   :  { %v302_v24 = vsel %vm299_vm1, %v283_v16, %v291_v55  ;;  %v310_v22 = vsel %vm299_vm1, %v291_v55, %v283_v16  ;;  %v335_v9 = vsel %vm332_vm2, %v318_v59, %v326_v60  ;;  %v343_v62 = vsel %vm332_vm2, %v326_v60, %v318_v59 }
 0x196   :  { %v461_v31 = vmul.f32 %v445_v14, %v445_v14  ;;  %v462_v8 = vmul.f32 %v446_v0, %v446_v0  ;;  %v353_v13 = vadd.f32 %v302_v24, %v269_v10  ;;  %v354_v45 = vadd.f32 %v310_v22, %v270_v7 }
 0x197   :  { %v304_v63 = vsel %vm299_vm1, %v285_v61, %v293_v1  ;;  %v312_v3 = vsel %vm299_vm1, %v293_v1, %v285_v61  ;;  %v337_v48 = vsel %vm332_vm2, %v320_v26, %v328_v29  ;;  %v345_v2 = vsel %vm332_vm2, %v328_v29, %v320_v26 }
 0x198   :  { %v232_v17 = vpop.permute.xlu1 %231  ;;  %478 = vst.msk [vmem:[%s999_s1] sm:$0xff] %vm477_vm3, %v461_v31  ;;  %v369_v25 = vadd.f32 %v353_v13, %v335_v9  ;;  %v370_v7 = vadd.f32 %v354_v45, %v343_v62  ;;  %v357_v32 = vadd.f32 %v304_v63, %v273_v37  ;;  %v358_v33 = vadd.f32 %v312_v3, %v274_v54 }
 0x199   :  { %v242_v34 = vpop.permute.xlu0 %241  ;;  %480 = vst.msk [vmem:[%s999_s1 + $0x8] sm:$0x3f] %vm479_vm4, %v462_v8  ;;  %v272_v21 = vadd.f32 %v232_v17, %v762_v6  ;;  %v889_v10 = vsel %vm299_vm1, %v396_v52, %v388_v56  ;;  %v246_v6 = vpop.permute.xlu2 %245  ;;  %v319_v59 = vrot.slane %v271_v15, 2  ;;  %v276_v1 = vadd.f32 %v240_v58, %v828_v5 }
 0x19a   :  { %v417_v27 = vmul.f32 0.125, %v369_v25  ;;  %v418_v37 = vmul.f32 0.125, %v370_v7  ;;  %v373_v39 = vadd.f32 %v357_v32, %v337_v48  ;;  %v374_v41 = vadd.f32 %v358_v33, %v345_v2 }
 0x19b   :  { %v292_v54 = vrot.slane %v272_v21, 1  ;;  %v327_v55 = vrot.slane %v272_v21, 2  ;;  %v279_v0 = vadd.f32 %v246_v6, %v215_v42  ;;  %v294_v42 = vrot.slane %v276_v1, 1 }
 0x19c   :  { %v449_v57 = vadd.f32 %v789_v12, %v417_v27  ;;  %v450_v4 = vadd.f32 %v791_v50, %v418_v37  ;;  %v421_v60 = vmul.f32 0.125, %v373_v39  ;;  %v422_v16 = vmul.f32 0.125, %v374_v41 }
 0x19d   :  { %v303_v44 = vsel %vm299_vm1, %v284_v53, %v292_v54  ;;  %v311_v52 = vsel %vm299_vm1, %v292_v54, %v284_v53  ;;  %v336_v50 = vsel %vm332_vm2, %v319_v59, %v327_v55  ;;  %v344_v29 = vsel %vm332_vm2, %v327_v55, %v319_v59 }
 0x19e   :  { %v465_v56 = vmul.f32 %v449_v57, %v449_v57  ;;  %v466_v61 = vmul.f32 %v450_v4, %v450_v4  ;;  %v453_v14 = vadd.f32 %v814_v23, %v421_v60  ;;  %v454_v12 = vadd.f32 %v824_v49, %v422_v16 }
 0x19f   :  { %v355_v26 = vadd.f32 %v303_v44, %v271_v15  ;;  %v356_v24 = vadd.f32 %v311_v52, %v272_v21  ;;  %v329_v13 = vrot.slane %v276_v1, 2  ;;  %v277_v45 = vadd.f32 %v242_v34, %v776_v35 }
 0x1a0   :  { %v238_v22 = vpop.permute.xlu1 %237  ;;  %483 = vst.msk [vmem:[%s999_s1 + $0x20] sm:$0xff] %vm477_vm3, %v465_v56  ;;  %v469_v5 = vmul.f32 %v453_v14, %v453_v14  ;;  %v470_v58 = vmul.f32 %v454_v12, %v454_v12  ;;  %v288_v62 = vrot.slane %v279_v0, 1  ;;  %v444_v52 = vmul.f32 -1.125, %v889_v10 }
 0x1a1   :  { %v275_v23 = vadd.f32 %v238_v22, %v782_v38  ;;  %v248_v49 = vpop.permute.xlu0 %247  ;;  %484 = vst.msk [vmem:[%s999_s1 + $0x28] sm:$0x3f] %vm479_vm4, %v466_v61  ;;  %v371_v15 = vadd.f32 %v355_v26, %v336_v50  ;;  %v372_v31 = vadd.f32 %v356_v24, %v344_v29  ;;  %v322_v24 = vrot.slane %v277_v45, 2 }
 0x1a2   :  { %v280_v8 = vadd.f32 %v248_v49, %v802_v18  ;;  %487 = vst.msk [vmem:[%s999_s1 + $0x40] sm:$0xff] %vm477_vm3, %v469_v5  ;;  %v323_v18 = vrot.slane %v279_v0, 2 }
 0x1a3   :  { %v286_v38 = vrot.slane %v275_v23, 1  ;;  %v321_v9 = vrot.slane %v275_v23, 2  ;;  %488 = vst.msk [vmem:[%s999_s1 + $0x48] sm:$0x3f] %vm479_vm4, %v470_v58  ;;  %v419_v63 = vmul.f32 0.125, %v371_v15  ;;  %v420_v3 = vmul.f32 0.125, %v372_v31 }
 0x1a4   :  { %v296_v17 = vrot.slane %v280_v8, 1  ;;  %v331_v32 = vrot.slane %v280_v8, 2 }
 0x1a5   :  { %v305_v25 = vsel %vm299_vm1, %v286_v38, %v294_v42  ;;  %v313_v7 = vsel %vm299_vm1, %v294_v42, %v286_v38  ;;  %v451_v35 = vadd.f32 %v764_v28, %v419_v63  ;;  %v452_v33 = vadd.f32 %v766_v30, %v420_v3 }
 0x1a6   :  { %v359_v34 = vadd.f32 %v305_v25, %v275_v23  ;;  %v360_v48 = vadd.f32 %v313_v7, %v276_v1  ;;  %v338_v2 = vsel %vm332_vm2, %v321_v9, %v329_v13  ;;  %v346_v21 = vsel %vm332_vm2, %v329_v13, %v321_v9 }
 0x1a7   :  { %v307_v27 = vsel %vm299_vm1, %v288_v62, %v296_v17  ;;  %v315_v37 = vsel %vm299_vm1, %v296_v17, %v288_v62  ;;  %v467_v39 = vmul.f32 %v451_v35, %v451_v35  ;;  %v468_v41 = vmul.f32 %v452_v33, %v452_v33 }
 0x1a8   :  { %v375_v53 = vadd.f32 %v359_v34, %v338_v2  ;;  %v376_v28 = vadd.f32 %v360_v48, %v346_v21  ;;  %v244_v54 = vpop.permute.xlu1 %243  ;;  %v443_v30 = vmul.f32 -1.125, %v874_v43  ;;  %v363_v55 = vadd.f32 %v307_v27, %v279_v0 }
 0x1a9   :  { %v364_v57 = vadd.f32 %v315_v37, %v280_v8  ;;  %v278_v4 = vadd.f32 %v244_v54, %v809_v19  ;;  %485 = vst.msk [vmem:[%s999_s1 + $0x30] sm:$0xff] %vm477_vm3, %v467_v39  ;;  %v340_v6 = vsel %vm332_vm2, %v323_v18, %v331_v32  ;;  %v348_v59 = vsel %vm332_vm2, %v331_v32, %v323_v18 }
 0x1aa   :  { %v423_v60 = vmul.f32 0.125, %v375_v53  ;;  %v424_v16 = vmul.f32 0.125, %v376_v28  ;;  %486 = vst.msk [vmem:[%s999_s1 + $0x38] sm:$0x3f] %vm479_vm4, %v468_v41  ;;  %v287_v43 = vrot.slane %v277_v45, 1  ;;  %v379_v19 = vadd.f32 %v363_v55, %v340_v6 }
 0x1ab   :  { %v380_v1 = vadd.f32 %v364_v57, %v348_v59  ;;  %v295_v44 = vrot.slane %v278_v4, 1  ;;  %v330_v14 = vrot.slane %v278_v4, 2 }
 0x1ac   :  { %v455_v56 = vadd.f32 %v839_v11, %v423_v60  ;;  %v456_v61 = vadd.f32 %v841_v51, %v424_v16  ;;  %v427_v12 = vmul.f32 0.125, %v379_v19  ;;  %v403_v11 = vsel %vm299_vm1, %v387_v36, %v395_v20 }
 0x1ad   :  { %v428_v0 = vmul.f32 0.125, %v380_v1  ;;  %v306_v50 = vsel %vm299_vm1, %v287_v43, %v295_v44  ;;  %v314_v26 = vsel %vm299_vm1, %v295_v44, %v287_v43  ;;  %v411_v51 = vsel %vm299_vm1, %v395_v20, %v387_v36 }
 0x1ae   :  { %v471_v22 = vmul.f32 %v455_v56, %v455_v56  ;;  %v472_v5 = vmul.f32 %v456_v61, %v456_v61  ;;  %v459_v58 = vadd.f32 %v443_v30, %v427_v12  ;;  %v361_v23 = vadd.f32 %v306_v50, %v277_v45 }
 0x1af   :  { %v460_v29 = vadd.f32 %v444_v52, %v428_v0  ;;  %v362_v10 = vadd.f32 %v314_v26, %v278_v4  ;;  %v339_v49 = vsel %vm332_vm2, %v322_v24, %v330_v14  ;;  %v347_v42 = vsel %vm332_vm2, %v330_v14, %v322_v24 }
 0x1b0   :  { %489 = vst.msk [vmem:[%s999_s1 + $0x50] sm:$0xff] %vm477_vm3, %v471_v22  ;;  %v475_v40 = vmul.f32 %v459_v58, %v459_v58  ;;  %v377_v15 = vadd.f32 %v361_v23, %v339_v49  ;;  %v441_v20 = vmul.f32 -1.125, %v403_v11  ;;  %v442_v31 = vmul.f32 -1.125, %v411_v51 }
 0x1b1   :  { %490 = vst.msk [vmem:[%s999_s1 + $0x58] sm:$0x3f] %vm479_vm4, %v472_v5  ;;  %v476_v46 = vmul.f32 %v460_v29, %v460_v29  ;;  %v378_v36 = vadd.f32 %v362_v10, %v347_v42 }
 0x1b2   :  { %493 = vst.msk [vmem:[%s999_s1 + $0x70] sm:$0xff] %vm477_vm3, %v475_v40  ;;  %v425_v8 = vmul.f32 0.125, %v377_v15 }
 0x1b3   :  { %v426_v13 = vmul.f32 0.125, %v378_v36  ;;  %494 = vst.msk [vmem:[%s999_s1 + $0x78] sm:$0x3f] %vm479_vm4, %v476_v46 }
 0x1b4   :  { %v457_v47 = vadd.f32 %v441_v20, %v425_v8 }
 0x1b5   :  { %v458_v45 = vadd.f32 %v442_v31, %v426_v13 }
 0x1b6   :  { %v473_v38 = vmul.f32 %v457_v47, %v457_v47 }
 0x1b7   :  { %v474_v9 = vmul.f32 %v458_v45, %v458_v45 }
 0x1b8   :  { %491 = vst.msk [vmem:[%s999_s1 + $0x60] sm:$0xff] %vm477_vm3, %v473_v38 }
 0x1b9   :  { %492 = vst.msk [vmem:[%s999_s1 + $0x68] sm:$0x3f] %vm479_vm4, %v474_v9 }
 0x1ba   :  { %499 = vsyncpa [#allocation3], 1 }

</bundles_post_ra>
